<compile_context>
chip_gen: v7x
topology: tpu7x:2x2x1
jax: 0.10.0
libtpu: 0.0.40
codegen_flags: <defaults>
</compile_context>

<pallas_src>
import functools

import jax
import jax.numpy as jnp
from jax.experimental import pallas as pl
from jax.experimental.pallas import tpu as pltpu

_MIB = 1024 * 1024


# ---------------------------------------------------------------------------
# Hardware / VMEM budgeting
# ---------------------------------------------------------------------------
def _vmem_capacity_bytes():
    try:
        cap = int(pltpu.get_tpu_info().vmem_capacity_bytes)
        # Clamp to a sane per-TensorCore range in case a per-chip number leaks
        # through on multi-core parts (v7x: 2 TC x 64 MiB).
        return min(max(cap, 32 * _MIB), 128 * _MIB)
    except Exception:
        return 64 * _MIB          # conservative: v7x per-TensorCore VMEM


_VMEM_CAP = _vmem_capacity_bytes()
# Scoped-VMEM limit handed to Mosaic: leave headroom for internal scratch.
_VMEM_LIMIT = max(min(int(_VMEM_CAP * 0.8), _VMEM_CAP - 12 * _MIB, 100 * _MIB),
                  16 * _MIB)
# Budget used for tile sizing (extra headroom for spills / compiler internals).
_TILE_BUDGET = int(_VMEM_CAP * 0.45)
# 512-row tiles already reach ~85% of the HBM roofline; larger tiles only cost
# VMEM and steal pipelining steps.
_MAX_TB = 512


def _round_up(x, m):
    return (x + m - 1) // m * m


def _sublane(dtype):
    # Packed-sublane tile height for the x dtype: 8 (32-bit), 16 (16-bit), 32 (8-bit).
    return {4: 8, 2: 16, 1: 32}.get(jnp.dtype(dtype).itemsize, 8)


def _choose_batch_tile(batch, per_row_bytes, resident_bytes, sub):
    """Largest batch tile (multiple of the dtype sublane tile) whose pipelined
    footprint fits the VMEM budget, while keeping enough grid steps for
    double-buffering and for megacore splitting on v7x."""
    b_pad = _round_up(batch, sub)
    avail = _TILE_BUDGET - resident_bytes
    if avail < sub * per_row_bytes:
        # TODO(synk): K-tile the weights (extra "arbitrary" grid axis + f32
        # accumulator scratch) when the resident weights alone overflow the
        # VMEM budget (large in_dim*hidden on v7x's 64 MiB/TC), instead of
        # degrading to a tiny batch tile.
        return sub
    tb = min((avail // per_row_bytes) // sub * sub, _MAX_TB)
    if b_pad >= 256:
        # >=4 grid steps at large batch (>=2 per TensorCore on v7x megacore),
        # but never shrink tiles below 128 rows just to add steps.
        tb = min(tb, max(_round_up(pl.cdiv(b_pad, 4), sub), 128))
    tb = min(tb, b_pad)
    return max(tb, sub)


def _resident_spec(shape):
    """Grid-invariant operand (weights/bias): constant index_map -> fetched
    once across the grid (no re-DMA); VMEM accounting assumes it may still be
    double-buffered by the pipeline."""
    return pl.BlockSpec(shape, lambda *_: (0,) * len(shape))


# ---------------------------------------------------------------------------
# Kernels
# ---------------------------------------------------------------------------
def _linear_kernel(x_ref, w_ref, b_ref, o_ref):
    # y = x @ W + b ; x is cast to the weight dtype in-register (hidden under DMA),
    # accumulation and bias add stay in f32.
    x = x_ref[...].astype(w_ref.dtype)
    y = jnp.dot(x, w_ref[...], preferred_element_type=jnp.float32)
    o_ref[...] = (y + b_ref[...]).astype(o_ref.dtype)


def _mlp_kernel(x_ref, w1_ref, b1_ref, w2_ref, b2_ref, o_ref):
    # h = relu(x @ W1 + b1); y = h @ W2 + b2  (f32 accumulation throughout)
    x = x_ref[...].astype(w1_ref.dtype)
    h = jnp.dot(x, w1_ref[...], preferred_element_type=jnp.float32)
    h = jnp.maximum(h + b1_ref[...], 0.0)
    y = jnp.dot(h.astype(w2_ref.dtype), w2_ref[...],
                preferred_element_type=jnp.float32)
    o_ref[...] = (y + b2_ref[...]).astype(o_ref.dtype)


# ---------------------------------------------------------------------------
# Forward wrapper
# ---------------------------------------------------------------------------
@functools.partial(jax.jit, static_argnames=("num_cls", "mlp"))
def classification_head(x, params, *, num_cls, mlp=False):
    """Forward pass of ClassificationHead.

    x:      (B, input_size), any float dtype (kept in HBM as-is; cast in-kernel).
    params: output of prepare_params() — pre-padded / pre-cast device weights.
    """
    B, in_dim = x.shape
    out_dtype = x.dtype
    xb = jnp.dtype(x.dtype).itemsize
    ob = jnp.dtype(out_dtype).itemsize
    sub = _sublane(x.dtype)

    if mlp:
        w1, b1, w2, b2 = params["w1"], params["b1"], params["w2"], params["b2"]
        k_pad, h_pad = w1.shape
        n_pad = w2.shape[1]
        wb = jnp.dtype(w1.dtype).itemsize
    else:
        w, b = params["w"], params["b"]
        k_pad, n_pad = w.shape
        wb = jnp.dtype(w.dtype).itemsize

    # Zero-pad the contraction dim of x only when in_dim is not 128-aligned
    # (the matching W rows were pre-zeroed at prepare_params time, so padded
    # columns contribute exactly zero).  No-op for aligned feature sizes.
    if in_dim != k_pad:
        x = jnp.pad(x, ((0, 0), (0, k_pad - in_dim)))

    if mlp:
        # Conservative VMEM accounting: double-buffered x/out tiles, possibly
        # double-buffered resident weights, f32 h + its compute-dtype copy,
        # f32 y before the output cast.
        resident = 2 * (k_pad * h_pad + h_pad * n_pad) * wb + 2 * (h_pad + n_pad) * 4
        per_row = (2 * k_pad * xb + 2 * n_pad * ob
                   + h_pad * 4 + h_pad * wb + n_pad * 4)
        tb = _choose_batch_tile(B, per_row, resident, sub)
        grid = (pl.cdiv(B, tb),)

        cost = pl.CostEstimate(
            flops=2 * B * k_pad * h_pad + 2 * B * h_pad * n_pad,
            transcendentals=0,
            bytes_accessed=(B * k_pad * xb
                            + (k_pad * h_pad + h_pad * n_pad) * wb
                            + (h_pad + n_pad) * 4
                            + B * n_pad * ob),
        )

        y = pl.pallas_call(
            _mlp_kernel,
            out_shape=jax.ShapeDtypeStruct((B, n_pad), out_dtype),
            grid_spec=pltpu.PrefetchScalarGridSpec(
                num_scalar_prefetch=0,
                grid=grid,
                in_specs=[
                    pl.BlockSpec((tb, k_pad), lambda i: (i, 0)),
                    _resident_spec((k_pad, h_pad)),
                    _resident_spec((1, h_pad)),
                    _resident_spec((h_pad, n_pad)),
                    _resident_spec((1, n_pad)),
                ],
                out_specs=pl.BlockSpec((tb, n_pad), lambda i: (i, 0)),
            ),
            compiler_params=pltpu.CompilerParams(
                dimension_semantics=("parallel",),
                vmem_limit_bytes=_VMEM_LIMIT),
            cost_estimate=cost,
        )(x, w1, b1, w2, b2)
    else:
        resident = 2 * k_pad * n_pad * wb + 2 * n_pad * 4
        per_row = 2 * k_pad * xb + 2 * n_pad * ob + n_pad * 4
        tb = _choose_batch_tile(B, per_row, resident, sub)
        grid = (pl.cdiv(B, tb),)

        cost = pl.CostEstimate(
            flops=2 * B * k_pad * n_pad,
            transcendentals=0,
            bytes_accessed=(B * k_pad * xb + k_pad * n_pad * wb
                            + n_pad * 4 + B * n_pad * ob),
        )

        y = pl.pallas_call(
            _linear_kernel,
            out_shape=jax.ShapeDtypeStruct((B, n_pad), out_dtype),
            grid_spec=pltpu.PrefetchScalarGridSpec(
                num_scalar_prefetch=0,
                grid=grid,
                in_specs=[
                    pl.BlockSpec((tb, k_pad), lambda i: (i, 0)),
                    _resident_spec((k_pad, n_pad)),
                    _resident_spec((1, n_pad)),
                ],
                out_specs=pl.BlockSpec((tb, n_pad), lambda i: (i, 0)),
            ),
            compiler_params=pltpu.CompilerParams(
                dimension_semantics=("parallel",),
                vmem_limit_bytes=_VMEM_LIMIT),
            cost_estimate=cost,
        )(x, w, b)

    # Skip the post-kernel slice entirely when num_cls is already lane-aligned.
    return y if n_pad == num_cls else y[:, :num_cls]


# ---------------------------------------------------------------------------
# Parameter construction
# ---------------------------------------------------------------------------
def _linear_init(key, fan_in, fan_out):
    # Matches nn.Linear default init: U(-1/sqrt(fan_in), 1/sqrt(fan_in)).
    kw, kb = jax.random.split(key)
    bound = 1.0 / jnp.sqrt(jnp.float32(fan_in))
    # Stored as (in, out) == W^T of PyTorch's (out, in) weight.
    w = jax.random.uniform(kw, (fan_in, fan_out), jnp.float32, -bound, bound)
    b = jax.random.uniform(kb, (1, fan_out), jnp.float32, -bound, bound)
    return w, b


def init_raw_params(key, input_size, hidden_size, num_cls, mlp=False):
    """Reference-layout parameters: (in, out) weights, (1, out) biases, f32."""
    if mlp:
        k1, k2 = jax.random.split(key)
        w1, b1 = _linear_init(k1, input_size, hidden_size)
        w2, b2 = _linear_init(k2, hidden_size, num_cls)
        return {"w1": w1, "b1": b1, "w2": w2, "b2": b2}
    w, b = _linear_init(key, input_size, num_cls)
    return {"w": w, "b": b}


def prepare_params(raw, *, mlp=False, compute_dtype=jnp.float32):
    """One-time (per model) padding + casting of weights for the kernel:
    feature dims zero-padded to 128-lane multiples, weights cast to the compute
    dtype (e.g. bf16 to halve weight HBM traffic), biases kept f32."""
    cdt = jnp.dtype(compute_dtype)

    def pad_w(w):
        i, o = w.shape
        return jnp.pad(w, ((0, _round_up(i, 128) - i),
                           (0, _round_up(o, 128) - o))).astype(cdt)

    def pad_b(b):
        o = b.shape[-1]
        b2d = jnp.asarray(b, jnp.float32).reshape(1, o)   # accepts 1-D or (1, out)
        return jnp.pad(b2d, ((0, 0), (0, _round_up(o, 128) - o)))

    if mlp:
        return {"w1": pad_w(raw["w1"]), "b1": pad_b(raw["b1"]),
                "w2": pad_w(raw["w2"]), "b2": pad_b(raw["b2"])}
    return {"w": pad_w(raw["w"]), "b": pad_b(raw["b"])}
    # TODO(synk): optional fp8 weight path (per-column scale folded into the
    # bias epilogue) for v7x inference — halves weight bytes vs bf16.


# ---------------------------------------------------------------------------
# Pure-JAX reference (mirrors the PyTorch forward exactly)
# ---------------------------------------------------------------------------
def reference(x, raw, mlp=False):
    if mlp:
        h = jnp.maximum(x @ raw["w1"] + raw["b1"], 0.0)
        return h @ raw["w2"] + raw["b2"]
    return x @ raw["w"] + raw["b"]


if __name__ == "__main__":
    key = jax.random.PRNGKey(0)
    kx, kp1, kp2 = jax.random.split(key, 3)

    batch, input_size, hidden_size, num_cls = 8, 32, 64, 10
    x = jax.random.normal(kx, (batch, input_size), jnp.float32)

    ok = True

    # mlp=False path: single Linear (f32 weights)
    raw_lin = init_raw_params(kp1, input_size, hidden_size, num_cls, mlp=False)
    p_lin = prepare_params(raw_lin, mlp=False, compute_dtype=jnp.float32)
    y_lin = jax.block_until_ready(
        classification_head(x, p_lin, num_cls=num_cls, mlp=False))
    ok &= y_lin.shape == (batch, num_cls)
    ok &= bool(jnp.allclose(y_lin, reference(x, raw_lin, mlp=False),
                            atol=1e-5, rtol=1e-5))

    # mlp=True path: Linear -> ReLU -> Linear (f32 weights)
    raw_mlp = init_raw_params(kp2, input_size, hidden_size, num_cls, mlp=True)
    p_mlp = prepare_params(raw_mlp, mlp=True, compute_dtype=jnp.float32)
    y_mlp = jax.block_until_ready(
        classification_head(x, p_mlp, num_cls=num_cls, mlp=True))
    ok &= y_mlp.shape == (batch, num_cls)
    ok &= bool(jnp.allclose(y_mlp, reference(x, raw_mlp, mlp=True),
                            atol=1e-5, rtol=1e-5))

    # bf16 weight path (recommended default on v5e/v6e: halves the dominant
    # weight HBM traffic; x stays f32 in HBM and is cast inside the kernel,
    # accumulation stays f32).
    p_bf16 = prepare_params(raw_mlp, mlp=True, compute_dtype=jnp.bfloat16)
    y_bf16 = jax.block_until_ready(
        classification_head(x, p_bf16, num_cls=num_cls, mlp=True))
    ok &= y_bf16.shape == (batch, num_cls)
    ok &= bool(jnp.allclose(y_bf16.astype(jnp.float32),
                            reference(x, raw_mlp, mlp=True),
                            atol=1e-1, rtol=1e-1))

    assert ok, "Pallas output mismatch vs reference"
    print("KERNEL_OK")
</pallas_src>

<mosaic_0001>
module attributes {stable_mosaic.version = 11 : i64} {
  func.func @_linear_kernel(%arg0: i32, %arg1: memref<8x128xf32, #tpu.memory_space<vmem>>, %arg2: memref<128x128xf32, #tpu.memory_space<vmem>>, %arg3: memref<1x128xf32, #tpu.memory_space<vmem>>, %arg4: memref<8x128xf32, #tpu.memory_space<vmem>>) attributes {dimension_semantics = [#tpu.dimension_semantics<parallel>], iteration_bounds = array<i64: 1>, scalar_prefetch = 0 : i64, scratch_operands = 0 : i64, tpu.core_type = #tpu.core_type<tc>, window_params = [{transform_indices = @transform_0, window_bounds = array<i64: 8, 128>}, {pipeline_mode = #tpu.pipeline_mode<synchronous>, transform_indices = @transform_1, window_bounds = array<i64: 128, 128>}, {pipeline_mode = #tpu.pipeline_mode<synchronous>, transform_indices = @transform_2, window_bounds = array<i64: 1, 128>}, {transform_indices = @transform_3, window_bounds = array<i64: 8, 128>}]} {
    %c0 = arith.constant 0 : index
    %c0_0 = arith.constant 0 : index
    %0 = vector.load %arg1[%c0, %c0_0] : memref<8x128xf32, #tpu.memory_space<vmem>>, vector<8x128xf32>
    %c0_1 = arith.constant 0 : index
    %c0_2 = arith.constant 0 : index
    %1 = vector.load %arg2[%c0_1, %c0_2] : memref<128x128xf32, #tpu.memory_space<vmem>>, vector<128x128xf32>
    %cst = arith.constant dense<0.000000e+00> : vector<8x128xf32>
    %2 = tpu.matmul %0, %1, %cst {dimension_numbers = #tpu.dot_dimension_numbers<[1], [0], [0], [1], [0, 0, 1, 1], [], []>} : vector<8x128xf32>, vector<128x128xf32>, vector<8x128xf32> -> vector<8x128xf32>
    %c0_3 = arith.constant 0 : index
    %c0_4 = arith.constant 0 : index
    %3 = vector.load %arg3[%c0_3, %c0_4] : memref<1x128xf32, #tpu.memory_space<vmem>>, vector<1x128xf32>
    %4 = vector.broadcast %3 : vector<1x128xf32> to vector<8x128xf32>
    %5 = arith.addf %2, %4 : vector<8x128xf32>
    %c0_5 = arith.constant 0 : index
    %c0_6 = arith.constant 0 : index
    %6 = vector.load %arg4[%c0_5, %c0_6] : memref<8x128xf32, #tpu.memory_space<vmem>>, vector<8x128xf32>
    tpu.vector_store %arg4[%c0_5, %c0_6], %5 {strides = array<i32>} : memref<8x128xf32, #tpu.memory_space<vmem>>, vector<8x128xf32>,
    return
  }
  func.func @transform_0(%arg0: i32) -> (i32, i32) {
    %c0_i32 = arith.constant 0 : i32
    %c0_i32_0 = arith.constant 0 : i32
    return %arg0, %c0_i32 : i32, i32
  }
  func.func @transform_1(%arg0: i32) -> (i32, i32) {
    %c0_i32 = arith.constant 0 : i32
    %c0_i32_0 = arith.constant 0 : i32
    %c0_i32_1 = arith.constant 0 : i32
    return %c0_i32, %c0_i32_0 : i32, i32
  }
  func.func @transform_2(%arg0: i32) -> (i32, i32) {
    %c0_i32 = arith.constant 0 : i32
    %c0_i32_0 = arith.constant 0 : i32
    %c0_i32_1 = arith.constant 0 : i32
    return %c0_i32, %c0_i32_0 : i32, i32
  }
  func.func @transform_3(%arg0: i32) -> (i32, i32) {
    %c0_i32 = arith.constant 0 : i32
    %c0_i32_0 = arith.constant 0 : i32
    return %arg0, %c0_i32 : i32, i32
  }
}

</mosaic_0001>

<bundles_post_ra>
// kernel: classification_head.1
= control target key start
LH: loop header
LB: loop body
LE: loop exit
PB: predicated region body
PF: predicated region fallthrough
CT: control target
= control target key end

     0   :  { %8 = vsyncpa [#allocation3], 0  ;;  %s328_s0 = inlined_call_operand.vmem [shape: f32[8,128], index: 0, kind: input, shape index: {}]   ;;  %s329_s1 = inlined_call_operand.hbm [shape: f32[128,128], index: 1, kind: input, shape index: {}]   ;;  %s330_s2 = inlined_call_operand.vmem [shape: f32[1,128], index: 2, kind: input, shape index: {}]   ;;  %s331_s3 = inlined_call_operand.hbm [shape: f32[8,128], index: 3, kind: output, shape index: {}]  }
   0x1   :  { %9 = vsyncpa [#allocation4], 0  ;;  %s271_s12 = smov [#allocation2]   ;;  %s223_s16 = scalar_lea.hbm %s329_s1, 2048 }
   0x2   :  { %s17_s13 = sshll.u32 %s271_s12, 4  ;;  %p224_p0 = scmp.ne.s32.totalorder %s329_s1, %s223_s16  ;;  %s18_s13 = int_to_ptr.vmem [resolvable:$true] %s17_s13 }
   0x3   :  { %p227_p1 = scmp.lt.u32.totalorder %s223_s16, %s329_s1 }
   0x5   :  { %p229_p2 = pnand %p227_p1, %p224_p0 }
   0x7   :  { %232 = shalt.err (!%p229_p2)
}
   0x8   :  { %s233_s21 = scalar_lea.vmem %s18_s13, 2048  ;;  %p238_p4 = scmp.lt.s32.totalorder %s18_s13, %s18_s13 }
   0x9   :  { %p234_p3 = scmp.ne.s32.totalorder %s18_s13, %s233_s21  ;;  %p239_p5 = scmp.lt.s32.totalorder %s233_s21, %s233_s21 }
   0xb   :  { %p240_p6 = por %p239_p5, %p238_p4 }
   0xd   :  { %p241_p7 = pnand %p240_p6, %p234_p3 }
   0xf   :  { %244 = shalt.err (!%p241_p7)
}
  0x10   :  { %s272_s22 = smov 128   ;;  %s273_s23 = smov 8  }
  0x11   :  { %23 = dma.hbm_to_vmem [thread:$0]  %s329_s1, 2048, %s18_s13, [#allocation3], %s272_s22, %s272_s22, %s273_s23  }
  0x12   :  { %267 = dma.done.wait [#allocation3], 2048  }
  0x13   :  { %268 = vsyncadd [#allocation3], 4294965248  ;;  %v274_v0 = vmov 0.0|0.0   ;;  %vm275_vm0 = vmmov 0   ;;  %v276_v1 = vmov 0.0   ;;  %v30_v2 = vld [vmem:[#allocation2] sm:$0xff] }
  0x14   :  { %192 = vmatprep.subr.bf16.mxu0 %v274_v0  ;;  %189 = vmatprep.mubr.msk.f32.mxu0 %vm275_vm0, %v276_v1  ;;  %v31_v3 = vld [vmem:[#allocation2 + $0x8] sm:$0xff]  ;;  %v32_v4 = vld [vmem:[#allocation2 + $0x10] sm:$0xff]  ;;  %v33_v6 = vld [vmem:[#allocation2 + $0x18] sm:$0xff]  ;;  %s277_s29 = smov [#allocation5]  }
  0x15   :  { %v193_v5 = vpack.c.bf16 %v31_v3, %v30_v2  ;;  %v196_v7 = vpack.c.bf16 %v33_v6, %v32_v4  ;;  %v34_v8 = vld [vmem:[#allocation2 + $0x20] sm:$0xff]  ;;  %v35_v9 = vld [vmem:[#allocation2 + $0x28] sm:$0xff]  ;;  %v36_v11 = vld [vmem:[#allocation2 + $0x30] sm:$0xff]  ;;  %s130_s30 = sshll.u32 %s277_s29, 4  ;;  %s131_s30 = int_to_ptr.vmem [resolvable:$true] %s130_s30 }
  0x16   :  { %v199_v10 = vpack.c.bf16 %v35_v9, %v34_v8  ;;  %v37_v12 = vld [vmem:[#allocation2 + $0x38] sm:$0xff]  ;;  %v38_v14 = vld [vmem:[#allocation2 + $0x40] sm:$0xff]  ;;  %v39_v15 = vld [vmem:[#allocation2 + $0x48] sm:$0xff]  ;;  %s245_s4 = scalar_lea.vmem %s131_s30, 128  ;;  %p250_p9 = scmp.lt.s32.totalorder %s131_s30, %s131_s30 }
  0x17   :  { %194 = vmatpush3.bf16.msra.mxu0 %v193_v5  ;;  %v202_v13 = vpack.c.bf16 %v37_v12, %v36_v11  ;;  %v205_v16 = vpack.c.bf16 %v39_v15, %v38_v14  ;;  %v40_v17 = vld [vmem:[#allocation2 + $0x50] sm:$0xff]  ;;  %v41_v18 = vld [vmem:[#allocation2 + $0x58] sm:$0xff]  ;;  %v42_v20 = vld [vmem:[#allocation2 + $0x60] sm:$0xff]  ;;  %p246_p8 = scmp.ne.s32.totalorder %s131_s30, %s245_s4  ;;  %p251_p10 = scmp.lt.s32.totalorder %s245_s4, %s245_s4 }
  0x18   :  { %195 = vmatprep.subr.bf16.mxu0 %v274_v0  ;;  %v208_v19 = vpack.c.bf16 %v41_v18, %v40_v17  ;;  %v43_v21 = vld [vmem:[#allocation2 + $0x68] sm:$0xff]  ;;  %v44_v23 = vld [vmem:[#allocation2 + $0x70] sm:$0xff]  ;;  %v45_v24 = vld [vmem:[#allocation2 + $0x78] sm:$0xff] }
  0x19   :  { %v211_v22 = vpack.c.bf16 %v43_v21, %v42_v20  ;;  %v214_v25 = vpack.c.bf16 %v45_v24, %v44_v23  ;;  %v29_v26 = vld [vmem:[%s328_s0] sm:$0xff]  ;;  %p252_p11 = por %p251_p10, %p250_p9 }
  0x1a   :  { %v139_v27 = vld [vmem:[%s330_s2] ss:$0 sm:$0xff] }
  0x1b   :  { %197 = vmatpush3.bf16.msra.mxu0 %v196_v7  ;;  %p253_p12 = pnand %p252_p11, %p246_p8 }
  0x1c   :  { %198 = vmatprep.subr.bf16.mxu0 %v274_v0 }
  0x1f   :  { %200 = vmatpush3.bf16.msra.mxu0 %v199_v10 }
  0x20   :  { %201 = vmatprep.subr.bf16.mxu0 %v274_v0 }
  0x23   :  { %203 = vmatpush3.bf16.msra.mxu0 %v202_v13 }
  0x24   :  { %204 = vmatprep.subr.bf16.mxu0 %v274_v0 }
  0x27   :  { %206 = vmatpush3.bf16.msra.mxu0 %v205_v16 }
  0x28   :  { %207 = vmatprep.subr.bf16.mxu0 %v274_v0 }
  0x2b   :  { %209 = vmatpush3.bf16.msra.mxu0 %v208_v19 }
  0x2c   :  { %210 = vmatprep.subr.bf16.mxu0 %v274_v0 }
  0x2f   :  { %212 = vmatpush3.bf16.msra.mxu0 %v211_v22 }
  0x30   :  { %213 = vmatprep.subr.bf16.mxu0 %v274_v0 }
  0x33   :  { %215 = vmatpush3.bf16.msra.mxu0 %v214_v25 }
  0x36   :  { %190 = vmatmul.mubr.f32.vlgmr.msra.gmra.mrb[0].mxu0 %v29_v26 }
 0x109   :  { %v119_v28 = vpop.f32.mrb[0].mxu0 }
 0x10a   :  { %v120_v29 = vadd.f32 %v139_v27, %v119_v28  ;;  %v191_v30 = vpop.f32.mrb[1].mxu0 }
 0x10c   :  { %123 = vst [vmem:[#allocation5] sm:$0xff] %v120_v29 }
 0x10d   :  { %256 = shalt.err (!%p253_p12)
}
 0x10e   :  { %s257_s6 = scalar_lea.hbm %s331_s3, 128 }
 0x10f   :  { %p258_p13 = scmp.ne.s32.totalorder %s331_s3, %s257_s6  ;;  %p261_p0 = scmp.lt.u32.totalorder %s257_s6, %s331_s3 }
 0x111   :  { %p263_p1 = pnand %p261_p0, %p258_p13 }
 0x113   :  { %266 = shalt.err (!%p263_p1)
}
 0x114   :  { %133 = dma.vmem_to_hbm [thread:$0]  %s131_s30, 128, %s331_s3, [#allocation4]  }
 0x115   :  { %269 = dma.done.wait [#allocation4], 128  }
 0x116   :  { %270 = vsyncadd [#allocation4], 4294967168 }
 0x117   :  { %137 = vsyncpa [#allocation3], 1 }
 0x118   :  { %138 = vsyncpa [#allocation4], 1 }

</bundles_post_ra>
